<compile_context>
chip_gen: v5e
topology: v5e:2x2
jax: 0.10.0
libtpu: 0.0.40
codegen_flags: <defaults>
</compile_context>

<pallas_src>
import functools

import jax
import jax.numpy as jnp
import numpy as np
from jax.experimental import pallas as pl
from jax.experimental.pallas import tpu as pltpu


def _mha_attn_kernel(q_ref, k_ref, wq_ref, wk_ref, out_ref, *,
                     heads_per_block, matmul_dtype):
    """One grid step = `heads_per_block` heads, all batch elements at once.

    q_ref  : (B, Lq, Dm)                 k_ref : (B, Lk, Dm)
    wq_ref : (hpb, Dm, Dk)  (1/temperature already folded into Q weights)
    wk_ref : (hpb, Dm, Dk)
    out_ref: (hpb*B, Lq, Lk)  attention probs for this head group, head-major.
    """
    q = q_ref[...].astype(matmul_dtype)          # (B, Lq, Dm)
    k = k_ref[...].astype(matmul_dtype)          # (B, Lk, Dm)

    scores = []
    for h in range(heads_per_block):             # unrolled: cross-head ILP
        wq = wq_ref[h].astype(matmul_dtype)      # (Dm, Dk)
        wk = wk_ref[h].astype(matmul_dtype)      # (Dm, Dk)

        # (b, l) are both free dims -> each einsum is a single MXU matmul over
        # the flattened B*L rows, f32 accumulation.
        qh = jnp.einsum("blm,md->bld", q, wq,
                        preferred_element_type=jnp.float32)
        kh = jnp.einsum("blm,md->bld", k, wk,
                        preferred_element_type=jnp.float32)

        # Scores: batched (Lq, Dk) @ (Dk, Lk). Temperature already in wq.
        s = jnp.einsum("bqd,bkd->bqk",
                       qh.astype(matmul_dtype), kh.astype(matmul_dtype),
                       preferred_element_type=jnp.float32)
        scores.append(s)

    # Head-major stacking -> row index (within the group) = h*B + b, matching
    # torch's permute(2,0,1,3).view(-1, Lq, Dk) ordering.
    s = jnp.concatenate(scores, axis=0)          # (hpb*B, Lq, Lk)

    # Softmax along the key (lane) axis, f32 throughout; one batched pass and
    # a single store for the whole head group.
    m = jnp.max(s, axis=-1, keepdims=True)
    p = jnp.exp(s - m)
    l = jnp.sum(p, axis=-1, keepdims=True)
    out_ref[...] = (p * pl.reciprocal(l, approx=True)).astype(out_ref.dtype)
    # TODO(synk): attention Dropout(p=0.1) is train-only; eval mode == identity.


def multi_head_attention(q, k, w_qs, w_ks, *, n_head, d_k,
                         heads_per_block=None, matmul_dtype=jnp.float32):
    """Forward of the PyTorch MultiHeadAttention (eval mode).

    q     : (B, Lq, d_model)
    k     : (B, Lk, d_model)
    w_qs  : (n_head*d_k, d_model)  torch nn.Linear weight (out, in), no bias
    w_ks  : (n_head*d_k, d_model)
    returns (n_head*B, Lq, Lk) attention probabilities, head-major ordering.
    """
    B, Lq, Dm = q.shape
    Bk, Lk, Dmk = k.shape
    assert B == Bk and Dm == Dmk
    assert w_qs.shape == (n_head * d_k, Dm) and w_ks.shape == (n_head * d_k, Dm)

    if heads_per_block is None:
        heads_per_block = n_head            # default: whole problem in 1 step
    assert n_head % heads_per_block == 0
    n_groups = n_head // heads_per_block

    temperature = float(np.sqrt(d_k))

    # x @ W^T has output column o = h*d_k + d  ->  per-head (Dm, d_k) slices,
    # stacked head-major. Fold 1/temperature into the Q weights (host-side).
    wq_h = (w_qs.T / temperature).reshape(Dm, n_head, d_k).transpose(1, 0, 2)
    wk_h = w_ks.T.reshape(Dm, n_head, d_k).transpose(1, 0, 2)   # (H, Dm, Dk)

    kernel = functools.partial(_mha_attn_kernel,
                               heads_per_block=heads_per_block,
                               matmul_dtype=matmul_dtype)

    flops = 2 * n_head * B * (Lq * Dm * d_k + Lk * Dm * d_k + Lq * Lk * d_k)
    transcendentals = n_head * B * Lq * Lk
    bytes_accessed = 4 * (q.size + k.size + wq_h.size + wk_h.size
                          + n_head * B * Lq * Lk)

    return pl.pallas_call(
        kernel,
        out_shape=jax.ShapeDtypeStruct((n_head * B, Lq, Lk), q.dtype),
        grid_spec=pltpu.PrefetchScalarGridSpec(
            num_scalar_prefetch=0,
            grid=(n_groups,),
            in_specs=[
                # Constant index_map -> q/k stay VMEM-resident across groups.
                pl.BlockSpec((B, Lq, Dm), lambda g: (0, 0, 0)),
                pl.BlockSpec((B, Lk, Dm), lambda g: (0, 0, 0)),
                # One stacked per-group weight slice each (single DMA).
                pl.BlockSpec((heads_per_block, Dm, d_k), lambda g: (g, 0, 0)),
                pl.BlockSpec((heads_per_block, Dm, d_k), lambda g: (g, 0, 0)),
            ],
            out_specs=pl.BlockSpec((heads_per_block * B, Lq, Lk),
                                   lambda g: (g, 0, 0)),
        ),
        compiler_params=pltpu.CompilerParams(
            dimension_semantics=("parallel",)),
        cost_estimate=pl.CostEstimate(flops=flops,
                                      transcendentals=transcendentals,
                                      bytes_accessed=bytes_accessed),
    )(q, k, wq_h, wk_h)


def mha_reference(q, k, w_qs, w_ks, *, n_head, d_k):
    """Pure-JAX replica of the PyTorch forward (eval mode)."""
    B, Lq, _ = q.shape
    _, Lk, _ = k.shape
    qp = (q @ w_qs.T).reshape(B, Lq, n_head, d_k)
    kp = (k @ w_ks.T).reshape(B, Lk, n_head, d_k)
    qp = jnp.transpose(qp, (2, 0, 1, 3)).reshape(n_head * B, Lq, d_k)
    kp = jnp.transpose(kp, (2, 0, 1, 3)).reshape(n_head * B, Lk, d_k)
    attn = jnp.einsum("nqd,nkd->nqk", qp, kp) / np.sqrt(d_k)
    return jax.nn.softmax(attn, axis=-1)


if __name__ == "__main__":
    # Small shapes consistent with the module: batch=2, seq=8, d_model=32,
    # n_head=4, d_k=16  ->  output (n_head*B, Lq, Lk) = (8, 8, 8).
    B, Lq, Lk = 2, 8, 8
    d_model, n_head, d_k = 32, 4, 16

    key = jax.random.PRNGKey(0)
    kq, kk, kwq, kwk = jax.random.split(key, 4)
    q = jax.random.normal(kq, (B, Lq, d_model), jnp.float32)
    k = jax.random.normal(kk, (B, Lk, d_model), jnp.float32)
    std = float(np.sqrt(2.0 / (d_model + d_k)))
    w_qs = std * jax.random.normal(kwq, (n_head * d_k, d_model), jnp.float32)
    w_ks = std * jax.random.normal(kwk, (n_head * d_k, d_model), jnp.float32)

    ref = mha_reference(q, k, w_qs, w_ks, n_head=n_head, d_k=d_k)

    # Default: all heads fused into a single grid step.
    out = multi_head_attention(q, k, w_qs, w_ks, n_head=n_head, d_k=d_k)
    out = jax.block_until_ready(out)
    assert out.shape == (n_head * B, Lq, Lk)
    max_err = float(jnp.max(jnp.abs(out - ref)))
    assert jnp.allclose(out, ref, atol=2e-3, rtol=2e-3), max_err

    # Head-tiled variant (grid over head groups; q/k stay VMEM-resident).
    out2 = multi_head_attention(q, k, w_qs, w_ks, n_head=n_head, d_k=d_k,
                                heads_per_block=2)
    out2 = jax.block_until_ready(out2)
    max_err2 = float(jnp.max(jnp.abs(out2 - ref)))
    assert jnp.allclose(out2, ref, atol=2e-3, rtol=2e-3), max_err2

    print("KERNEL_OK")
</pallas_src>

<mosaic_0001>
module attributes {stable_mosaic.version = 11 : i64} {
  func.func @_mha_attn_kernel(%arg0: i32, %arg1: memref<2x8x32xf32, #tpu.memory_space<vmem>>, %arg2: memref<2x8x32xf32, #tpu.memory_space<vmem>>, %arg3: memref<4x32x16xf32, #tpu.memory_space<vmem>>, %arg4: memref<4x32x16xf32, #tpu.memory_space<vmem>>, %arg5: memref<8x8x8xf32, #tpu.memory_space<vmem>>) attributes {dimension_semantics = [#tpu.dimension_semantics<parallel>], iteration_bounds = array<i64: 1>, scalar_prefetch = 0 : i64, scratch_operands = 0 : i64, tpu.core_type = #tpu.core_type<tc>, window_params = [{pipeline_mode = #tpu.pipeline_mode<synchronous>, transform_indices = @transform_0, window_bounds = array<i64: 2, 8, 32>}, {pipeline_mode = #tpu.pipeline_mode<synchronous>, transform_indices = @transform_1, window_bounds = array<i64: 2, 8, 32>}, {transform_indices = @transform_2, window_bounds = array<i64: 4, 32, 16>}, {transform_indices = @transform_3, window_bounds = array<i64: 4, 32, 16>}, {transform_indices = @transform_4, window_bounds = array<i64: 8, 8, 8>}]} {
    %c0 = arith.constant 0 : index
    %c0_0 = arith.constant 0 : index
    %c0_1 = arith.constant 0 : index
    %0 = vector.load %arg1[%c0, %c0_0, %c0_1] : memref<2x8x32xf32, #tpu.memory_space<vmem>>, vector<2x8x32xf32>
    %c0_2 = arith.constant 0 : index
    %c0_3 = arith.constant 0 : index
    %c0_4 = arith.constant 0 : index
    %1 = vector.load %arg2[%c0_2, %c0_3, %c0_4] : memref<2x8x32xf32, #tpu.memory_space<vmem>>, vector<2x8x32xf32>
    %c0_5 = arith.constant 0 : index
    %c0_6 = arith.constant 0 : index
    %c0_7 = arith.constant 0 : index
    %2 = vector.load %arg3[%c0_5, %c0_6, %c0_7] : memref<4x32x16xf32, #tpu.memory_space<vmem>>, vector<1x32x16xf32>
    %3 = vector.shape_cast %2 : vector<1x32x16xf32> to vector<32x16xf32>
    %c0_8 = arith.constant 0 : index
    %c0_9 = arith.constant 0 : index
    %c0_10 = arith.constant 0 : index
    %4 = vector.load %arg4[%c0_8, %c0_9, %c0_10] : memref<4x32x16xf32, #tpu.memory_space<vmem>>, vector<1x32x16xf32>
    %5 = vector.shape_cast %4 : vector<1x32x16xf32> to vector<32x16xf32>
    "tpu.trace_start"() <{level = 10 : i32, message = "blm,md->bld"}> : () -> ()
    %cst = arith.constant dense<0.000000e+00> : vector<2x8x16xf32>
    %6 = tpu.matmul %0, %3, %cst {dimension_numbers = #tpu.dot_dimension_numbers<[2], [0], [0, 1], [1], [0, 0, 0, 1, 1, 1], [], []>} : vector<2x8x32xf32>, vector<32x16xf32>, vector<2x8x16xf32> -> vector<2x8x16xf32>
    %cst_11 = arith.constant dense<0.000000e+00> : vector<2x8x16xf32>
    %7 = tpu.matmul %1, %5, %cst_11 {dimension_numbers = #tpu.dot_dimension_numbers<[2], [0], [0, 1], [1], [0, 0, 0, 1, 1, 1], [], []>} : vector<2x8x32xf32>, vector<32x16xf32>, vector<2x8x16xf32> -> vector<2x8x16xf32>
    "tpu.trace_stop"() : () -> ()
    "tpu.trace_start"() <{level = 10 : i32, message = "bqd,bkd->bqk"}> : () -> ()
    %cst_12 = arith.constant dense<0.000000e+00> : vector<2x8x8xf32>
    %8 = tpu.matmul %6, %7, %cst_12 {dimension_numbers = #tpu.dot_dimension_numbers<[2], [2], [1], [1], [0, 0, 0, 1, 1, 1], [0], [0]>} : vector<2x8x16xf32>, vector<2x8x16xf32>, vector<2x8x8xf32> -> vector<2x8x8xf32>
    "tpu.trace_stop"() : () -> ()
    %c1 = arith.constant 1 : index
    %c0_13 = arith.constant 0 : index
    %c0_14 = arith.constant 0 : index
    %9 = vector.load %arg3[%c1, %c0_13, %c0_14] : memref<4x32x16xf32, #tpu.memory_space<vmem>>, vector<1x32x16xf32>
    %10 = vector.shape_cast %9 : vector<1x32x16xf32> to vector<32x16xf32>
    %c1_15 = arith.constant 1 : index
    %c0_16 = arith.constant 0 : index
    %c0_17 = arith.constant 0 : index
    %11 = vector.load %arg4[%c1_15, %c0_16, %c0_17] : memref<4x32x16xf32, #tpu.memory_space<vmem>>, vector<1x32x16xf32>
    %12 = vector.shape_cast %11 : vector<1x32x16xf32> to vector<32x16xf32>
    "tpu.trace_start"() <{level = 10 : i32, message = "blm,md->bld"}> : () -> ()
    %cst_18 = arith.constant dense<0.000000e+00> : vector<2x8x16xf32>
    %13 = tpu.matmul %0, %10, %cst_18 {dimension_numbers = #tpu.dot_dimension_numbers<[2], [0], [0, 1], [1], [0, 0, 0, 1, 1, 1], [], []>} : vector<2x8x32xf32>, vector<32x16xf32>, vector<2x8x16xf32> -> vector<2x8x16xf32>
    %cst_19 = arith.constant dense<0.000000e+00> : vector<2x8x16xf32>
    %14 = tpu.matmul %1, %12, %cst_19 {dimension_numbers = #tpu.dot_dimension_numbers<[2], [0], [0, 1], [1], [0, 0, 0, 1, 1, 1], [], []>} : vector<2x8x32xf32>, vector<32x16xf32>, vector<2x8x16xf32> -> vector<2x8x16xf32>
    "tpu.trace_stop"() : () -> ()
    "tpu.trace_start"() <{level = 10 : i32, message = "bqd,bkd->bqk"}> : () -> ()
    %cst_20 = arith.constant dense<0.000000e+00> : vector<2x8x8xf32>
    %15 = tpu.matmul %13, %14, %cst_20 {dimension_numbers = #tpu.dot_dimension_numbers<[2], [2], [1], [1], [0, 0, 0, 1, 1, 1], [0], [0]>} : vector<2x8x16xf32>, vector<2x8x16xf32>, vector<2x8x8xf32> -> vector<2x8x8xf32>
    "tpu.trace_stop"() : () -> ()
    %c2 = arith.constant 2 : index
    %c0_21 = arith.constant 0 : index
    %c0_22 = arith.constant 0 : index
    %16 = vector.load %arg3[%c2, %c0_21, %c0_22] : memref<4x32x16xf32, #tpu.memory_space<vmem>>, vector<1x32x16xf32>
    %17 = vector.shape_cast %16 : vector<1x32x16xf32> to vector<32x16xf32>
    %c2_23 = arith.constant 2 : index
    %c0_24 = arith.constant 0 : index
    %c0_25 = arith.constant 0 : index
    %18 = vector.load %arg4[%c2_23, %c0_24, %c0_25] : memref<4x32x16xf32, #tpu.memory_space<vmem>>, vector<1x32x16xf32>
    %19 = vector.shape_cast %18 : vector<1x32x16xf32> to vector<32x16xf32>
    "tpu.trace_start"() <{level = 10 : i32, message = "blm,md->bld"}> : () -> ()
    %cst_26 = arith.constant dense<0.000000e+00> : vector<2x8x16xf32>
    %20 = tpu.matmul %0, %17, %cst_26 {dimension_numbers = #tpu.dot_dimension_numbers<[2], [0], [0, 1], [1], [0, 0, 0, 1, 1, 1], [], []>} : vector<2x8x32xf32>, vector<32x16xf32>, vector<2x8x16xf32> -> vector<2x8x16xf32>
    %cst_27 = arith.constant dense<0.000000e+00> : vector<2x8x16xf32>
    %21 = tpu.matmul %1, %19, %cst_27 {dimension_numbers = #tpu.dot_dimension_numbers<[2], [0], [0, 1], [1], [0, 0, 0, 1, 1, 1], [], []>} : vector<2x8x32xf32>, vector<32x16xf32>, vector<2x8x16xf32> -> vector<2x8x16xf32>
    "tpu.trace_stop"() : () -> ()
    "tpu.trace_start"() <{level = 10 : i32, message = "bqd,bkd->bqk"}> : () -> ()
    %cst_28 = arith.constant dense<0.000000e+00> : vector<2x8x8xf32>
    %22 = tpu.matmul %20, %21, %cst_28 {dimension_numbers = #tpu.dot_dimension_numbers<[2], [2], [1], [1], [0, 0, 0, 1, 1, 1], [0], [0]>} : vector<2x8x16xf32>, vector<2x8x16xf32>, vector<2x8x8xf32> -> vector<2x8x8xf32>
    "tpu.trace_stop"() : () -> ()
    %c3 = arith.constant 3 : index
    %c0_29 = arith.constant 0 : index
    %c0_30 = arith.constant 0 : index
    %23 = vector.load %arg3[%c3, %c0_29, %c0_30] : memref<4x32x16xf32, #tpu.memory_space<vmem>>, vector<1x32x16xf32>
    %24 = vector.shape_cast %23 : vector<1x32x16xf32> to vector<32x16xf32>
    %c3_31 = arith.constant 3 : index
    %c0_32 = arith.constant 0 : index
    %c0_33 = arith.constant 0 : index
    %25 = vector.load %arg4[%c3_31, %c0_32, %c0_33] : memref<4x32x16xf32, #tpu.memory_space<vmem>>, vector<1x32x16xf32>
    %26 = vector.shape_cast %25 : vector<1x32x16xf32> to vector<32x16xf32>
    "tpu.trace_start"() <{level = 10 : i32, message = "blm,md->bld"}> : () -> ()
    %cst_34 = arith.constant dense<0.000000e+00> : vector<2x8x16xf32>
    %27 = tpu.matmul %0, %24, %cst_34 {dimension_numbers = #tpu.dot_dimension_numbers<[2], [0], [0, 1], [1], [0, 0, 0, 1, 1, 1], [], []>} : vector<2x8x32xf32>, vector<32x16xf32>, vector<2x8x16xf32> -> vector<2x8x16xf32>
    %cst_35 = arith.constant dense<0.000000e+00> : vector<2x8x16xf32>
    %28 = tpu.matmul %1, %26, %cst_35 {dimension_numbers = #tpu.dot_dimension_numbers<[2], [0], [0, 1], [1], [0, 0, 0, 1, 1, 1], [], []>} : vector<2x8x32xf32>, vector<32x16xf32>, vector<2x8x16xf32> -> vector<2x8x16xf32>
    "tpu.trace_stop"() : () -> ()
    "tpu.trace_start"() <{level = 10 : i32, message = "bqd,bkd->bqk"}> : () -> ()
    %cst_36 = arith.constant dense<0.000000e+00> : vector<2x8x8xf32>
    %29 = tpu.matmul %27, %28, %cst_36 {dimension_numbers = #tpu.dot_dimension_numbers<[2], [2], [1], [1], [0, 0, 0, 1, 1, 1], [0], [0]>} : vector<2x8x16xf32>, vector<2x8x16xf32>, vector<2x8x8xf32> -> vector<2x8x8xf32>
    "tpu.trace_stop"() : () -> ()
    %30 = tpu.concatenate %8, %15, %22, %29 in 0 : vector<2x8x8xf32>, vector<2x8x8xf32>, vector<2x8x8xf32>, vector<2x8x8xf32> -> vector<8x8x8xf32>
    %cst_37 = arith.constant dense<0xFF800000> : vector<8x8xf32>
    %31 = vector.multi_reduction <maximumf>, %30, %cst_37 [2] : vector<8x8x8xf32> to vector<8x8xf32>
    %32 = vector.shape_cast %31 : vector<8x8xf32> to vector<8x8x1xf32>
    %33 = vector.broadcast %32 : vector<8x8x1xf32> to vector<8x8x8xf32>
    %34 = arith.subf %30, %33 : vector<8x8x8xf32>
    %35 = math.exp %34 : vector<8x8x8xf32>
    %cst_38 = arith.constant dense<0.000000e+00> : vector<8x8xf32>
    %36 = vector.multi_reduction <add>, %35, %cst_38 [2] : vector<8x8x8xf32> to vector<8x8xf32>
    %37 = vector.shape_cast %36 : vector<8x8xf32> to vector<8x8x1xf32>
    %38 = tpu.reciprocal %37 {approx = true} : vector<8x8x1xf32> -> vector<8x8x1xf32>
    %39 = vector.broadcast %38 : vector<8x8x1xf32> to vector<8x8x8xf32>
    %40 = arith.mulf %35, %39 : vector<8x8x8xf32>
    %c0_39 = arith.constant 0 : index
    %c0_40 = arith.constant 0 : index
    %c0_41 = arith.constant 0 : index
    %41 = vector.load %arg5[%c0_39, %c0_40, %c0_41] : memref<8x8x8xf32, #tpu.memory_space<vmem>>, vector<8x8x8xf32>
    tpu.vector_store %arg5[%c0_39, %c0_40, %c0_41], %40 {strides = array<i32>} : memref<8x8x8xf32, #tpu.memory_space<vmem>>, vector<8x8x8xf32>,
    return
  }
  func.func @transform_0(%arg0: i32) -> (i32, i32, i32) {
    %c0_i32 = arith.constant 0 : i32
    %c0_i32_0 = arith.constant 0 : i32
    %c0_i32_1 = arith.constant 0 : i32
    %c0_i32_2 = arith.constant 0 : i32
    return %c0_i32, %c0_i32_0, %c0_i32_1 : i32, i32, i32
  }
  func.func @transform_1(%arg0: i32) -> (i32, i32, i32) {
    %c0_i32 = arith.constant 0 : i32
    %c0_i32_0 = arith.constant 0 : i32
    %c0_i32_1 = arith.constant 0 : i32
    %c0_i32_2 = arith.constant 0 : i32
    return %c0_i32, %c0_i32_0, %c0_i32_1 : i32, i32, i32
  }
  func.func @transform_2(%arg0: i32) -> (i32, i32, i32) {
    %c0_i32 = arith.constant 0 : i32
    %c0_i32_0 = arith.constant 0 : i32
    %c0_i32_1 = arith.constant 0 : i32
    return %arg0, %c0_i32, %c0_i32_0 : i32, i32, i32
  }
  func.func @transform_3(%arg0: i32) -> (i32, i32, i32) {
    %c0_i32 = arith.constant 0 : i32
    %c0_i32_0 = arith.constant 0 : i32
    %c0_i32_1 = arith.constant 0 : i32
    return %arg0, %c0_i32, %c0_i32_0 : i32, i32, i32
  }
  func.func @transform_4(%arg0: i32) -> (i32, i32, i32) {
    %c0_i32 = arith.constant 0 : i32
    %c0_i32_0 = arith.constant 0 : i32
    %c0_i32_1 = arith.constant 0 : i32
    return %arg0, %c0_i32, %c0_i32_0 : i32, i32, i32
  }
}

</mosaic_0001>

<bundles_post_ra>
// kernel: tpu_custom_call.1
= control target key start
LH: loop header
LB: loop body
LE: loop exit
PB: predicated region body
PF: predicated region fallthrough
CT: control target
= control target key end

     0   :  { %s921_s0 = inlined_call_operand.vmem [shape: f32[2,8,32], index: 0, kind: input, shape index: {}]   ;;  %s922_s1 = inlined_call_operand.vmem [shape: f32[2,8,32], index: 1, kind: input, shape index: {}]   ;;  %s923_s2 = inlined_call_operand.vmem [shape: f32[4,32,16], index: 2, kind: input, shape index: {}]   ;;  %s924_s3 = inlined_call_operand.vmem [shape: f32[4,32,16], index: 3, kind: input, shape index: {}]   ;;  %s925_s4 = inlined_call_operand.hbm [shape: f32[8,8,8], index: 4, kind: output, shape index: {}]  }
   0x1   :  { %v29_v0 = vld [vmem:[%s924_s3 + $0x18] sm:$0xff]  ;;  %v28_v1 = vld [vmem:[%s924_s3 + $0x10] sm:$0xff]  ;;  %v27_v4 = vld [vmem:[%s924_s3 + $0x8] sm:$0xff] }
   0x2   :  { %v25_v2 = vld [vmem:[%s923_s2 + $0x18] sm:$0xff]  ;;  %78 = vmatpush.msra.mxu1 %v29_v0  ;;  %v24_v3 = vld [vmem:[%s923_s2 + $0x10] sm:$0xff]  ;;  %v23_v5 = vld [vmem:[%s923_s2 + $0x8] sm:$0xff] }
   0x3   :  { %49 = vmatpush.msra.mxu0 %v25_v2  ;;  %v26_v6 = vld [vmem:[%s924_s3] sm:$0xff] }
   0x4   :  { %79 = vmatpush.msra.mxu1 %v28_v1  ;;  %v22_v7 = vld [vmem:[%s923_s2] sm:$0xff] }
   0x5   :  { %50 = vmatpush.msra.mxu0 %v24_v3 }
   0x6   :  { %9 = vsyncpa [#allocation3], 0  ;;  %80 = vmatpush.msra.mxu1 %v27_v4  ;;  %v753_v8 = vld [vmem:[%s922_s1] sm:$0xff]  ;;  %vm30_vm0 = vcmask 261120   ;;  %v767_v10 = vld [vmem:[%s922_s1 + $0x8] sm:$0xff]  ;;  %vm89_vm1 = vcmask 130048  }
   0x7   :  { %51 = vmatpush.msra.mxu0 %v23_v5  ;;  %v758_v9 = vld [vmem:[%s921_s0] sm:$0xff]  ;;  %v772_v11 = vld [vmem:[%s921_s0 + $0x8] sm:$0xff]  ;;  %v592_v12 = vld [vmem:[%s923_s2 + $0x38] sm:$0xff]  ;;  %vm466_vm2 = vcmask 64512   ;;  %s569_s7 = sshll.u32 %s925_s4, 4  ;;  %s699_s8 = smov 128   ;;  %s570_s7 = int_to_ptr.hbm [resolvable:$true] %s569_s7 }
   0x8   :  { %81 = vmatpush.msra.mxu1 %v26_v6  ;;  %v591_v15 = vld [vmem:[%s923_s2 + $0x30] sm:$0xff]  ;;  %v590_v16 = vld [vmem:[%s923_s2 + $0x28] sm:$0xff]  ;;  %v589_v17 = vld [vmem:[%s923_s2 + $0x20] sm:$0xff]  ;;  %s700_s9 = smov 8  }
   0x9   :  { %52 = vmatpush.msra.mxu0 %v22_v7  ;;  %583 = vmatmul.msk.f32.vlgmr.msra.gmra.mxu1 %vm30_vm0, %v753_v8  ;;  %v596_v18 = vld [vmem:[%s924_s3 + $0x38] sm:$0xff]  ;;  %v595_v22 = vld [vmem:[%s924_s3 + $0x30] sm:$0xff]  ;;  %v594_v24 = vld [vmem:[%s924_s3 + $0x28] sm:$0xff] }
   0xa   :  { %581 = vmatmul.msk.f32.vlgmr.msra.gmra.mxu0 %vm30_vm0, %v758_v9  ;;  %v608_v19 = vld [vmem:[%s923_s2 + $0x58] sm:$0xff]  ;;  %v607_v23 = vld [vmem:[%s923_s2 + $0x50] sm:$0xff]  ;;  %v606_v25 = vld [vmem:[%s923_s2 + $0x48] sm:$0xff] }
   0xb   :  { %v593_v26 = vld [vmem:[%s924_s3 + $0x20] sm:$0xff]  ;;  %v612_v28 = vld [vmem:[%s924_s3 + $0x58] sm:$0xff]  ;;  %v611_v29 = vld [vmem:[%s924_s3 + $0x50] sm:$0xff] }
   0xc   :  { %v605_v27 = vld [vmem:[%s923_s2 + $0x40] sm:$0xff]  ;;  %v610_v30 = vld [vmem:[%s924_s3 + $0x48] sm:$0xff]  ;;  %v624_v41 = vld [vmem:[%s923_s2 + $0x78] sm:$0xff] }
   0xd   :  { %v609_v31 = vld [vmem:[%s924_s3 + $0x40] sm:$0xff]  ;;  %v623_v43 = vld [vmem:[%s923_s2 + $0x70] sm:$0xff]  ;;  %v622_v44 = vld [vmem:[%s923_s2 + $0x68] sm:$0xff] }
   0xe   :  { %v621_v45 = vld [vmem:[%s923_s2 + $0x60] sm:$0xff]  ;;  %v628_v46 = vld [vmem:[%s924_s3 + $0x78] sm:$0xff]  ;;  %v627_v49 = vld [vmem:[%s924_s3 + $0x70] sm:$0xff] }
   0xf   :  { %v626_v50 = vld [vmem:[%s924_s3 + $0x68] sm:$0xff]  ;;  %v625_v51 = vld [vmem:[%s924_s3 + $0x60] sm:$0xff]  ;;  %s698_s3 = smov [#allocation2]  }
  0x10   :  { %s567_s30 = sshll.u32 %s698_s3, 4  ;;  %s568_s30 = int_to_ptr.vmem [resolvable:$true] %s567_s30 }
  0x11   :  { %584 = vmatmul.msk.f32.gmra.mxu1 %vm30_vm0, %v767_v10 }
  0x12   :  { %582 = vmatmul.msk.f32.gmra.mxu0 %vm30_vm0, %v772_v11 }
  0x86   :  { %v83_v13 = vpop.f32.mrf.mxu1 }
  0x87   :  { %v54_v14 = vpop.f32.mrf.mxu0  ;;  %585 = vmatpush.xpose.msk.msra.mxu2 %vm89_vm1, %v83_v13 }
  0x8a   :  { %586 = vmatmul.msk.f32.vlgmr.msra.gmra.mxu2 %vm89_vm1, %v54_v14 }
  0x8b   :  { %164 = vmatpush.msrb.mxu2 %v592_v12 }
  0x8d   :  { %165 = vmatpush.msrb.mxu2 %v591_v15 }
  0x8e   :  { %v86_v20 = vpop.f32.mrf.mxu1 }
  0x8f   :  { %166 = vmatpush.msrb.mxu2 %v590_v16  ;;  %587 = vmatpush.xpose.msk.msra.mxu3 %vm89_vm1, %v86_v20  ;;  %v57_v21 = vpop.f32.mrf.mxu0 }
  0x91   :  { %167 = vmatpush.msrb.mxu2 %v589_v17 }
  0x92   :  { %588 = vmatmul.msk.f32.vlgmr.msra.gmra.mxu3 %vm89_vm1, %v57_v21  ;;  %597 = vmatmul.msk.f32.vlgmr.msrb.gmra.mxu2 %vm30_vm0, %v758_v9 }
  0x93   :  { %187 = vmatpush.msrb.mxu3 %v596_v18  ;;  %272 = vmatpush.msra.mxu2 %v608_v19 }
  0x95   :  { %188 = vmatpush.msrb.mxu3 %v595_v22  ;;  %273 = vmatpush.msra.mxu2 %v607_v23 }
  0x97   :  { %189 = vmatpush.msrb.mxu3 %v594_v24  ;;  %274 = vmatpush.msra.mxu2 %v606_v25 }
  0x99   :  { %190 = vmatpush.msrb.mxu3 %v593_v26  ;;  %275 = vmatpush.msra.mxu2 %v605_v27 }
  0x9a   :  { %599 = vmatmul.msk.f32.vlgmr.msrb.gmra.mxu3 %vm30_vm0, %v753_v8  ;;  %598 = vmatmul.msk.f32.gmra.mxu2 %vm30_vm0, %v772_v11 }
  0x9b   :  { %295 = vmatpush.msra.mxu3 %v612_v28 }
  0x9d   :  { %296 = vmatpush.msra.mxu3 %v611_v29 }
  0x9f   :  { %297 = vmatpush.msra.mxu3 %v610_v30 }
  0xa1   :  { %298 = vmatpush.msra.mxu3 %v609_v31 }
  0xa2   :  { %600 = vmatmul.msk.f32.gmra.mxu3 %vm30_vm0, %v767_v10  ;;  %613 = vmatmul.msk.f32.vlgmr.msra.gmra.mxu2 %vm30_vm0, %v758_v9 }
  0xaa   :  { %615 = vmatmul.msk.f32.vlgmr.msra.gmra.mxu3 %vm30_vm0, %v753_v8  ;;  %614 = vmatmul.msk.f32.gmra.mxu2 %vm30_vm0, %v772_v11 }
  0xb2   :  { %616 = vmatmul.msk.f32.gmra.mxu3 %vm30_vm0, %v767_v10 }
 0x10d   :  { %v113_v32 = vpop.f32.mrf.mxu2 }
 0x10e   :  { %v467_v33 = vsel %vm466_vm2, %v113_v32, -inf }
 0x10f   :  { %468 = vmax.xlane.f32.xlu0 %v467_v33 }
 0x115   :  { %v847_v34 = vpop.f32.mrf.mxu3  ;;  %v169_v36 = vpop.f32.mrf.mxu2 }
 0x116   :  { %v470_v35 = vsel %vm466_vm2, %v847_v34, -inf }
 0x117   :  { %471 = vmax.xlane.f32.xlu0 %v470_v35 }
 0x11d   :  { %v192_v37 = vpop.f32.mrf.mxu3  ;;  %v172_v38 = vpop.f32.mrf.mxu2 }
 0x11e   :  { %601 = vmatpush.xpose.msk.msrb.mxu0 %vm89_vm1, %v192_v37 }
 0x121   :  { %602 = vmatmul.msk.f32.vlgmr.msrb.gmra.mxu0 %vm89_vm1, %v169_v36 }
 0x125   :  { %v195_v39 = vpop.f32.mrf.mxu3  ;;  %v277_v40 = vpop.f32.mrf.mxu2 }
 0x126   :  { %603 = vmatpush.xpose.msk.msrb.mxu1 %vm89_vm1, %v195_v39 }
 0x129   :  { %604 = vmatmul.msk.f32.vlgmr.msrb.gmra.mxu1 %vm89_vm1, %v172_v38 }
 0x12d   :  { %v300_v42 = vpop.f32.mrf.mxu3  ;;  %v280_v48 = vpop.f32.mrf.mxu2 }
 0x12e   :  { %617 = vmatpush.xpose.msk.msra.mxu0 %vm89_vm1, %v300_v42 }
 0x131   :  { %618 = vmatmul.msk.f32.vlgmr.msra.gmra.mxu0 %vm89_vm1, %v277_v40 }
 0x132   :  { %380 = vmatpush.msrb.mxu0 %v624_v41 }
 0x134   :  { %381 = vmatpush.msrb.mxu0 %v623_v43 }
 0x135   :  { %v303_v47 = vpop.f32.mrf.mxu3 }
 0x136   :  { %382 = vmatpush.msrb.mxu0 %v622_v44  ;;  %619 = vmatpush.xpose.msk.msra.mxu1 %vm89_vm1, %v303_v47 }
 0x138   :  { %383 = vmatpush.msrb.mxu0 %v621_v45 }
 0x139   :  { %620 = vmatmul.msk.f32.vlgmr.msra.gmra.mxu1 %vm89_vm1, %v280_v48  ;;  %629 = vmatmul.msk.f32.vlgmr.msrb.gmra.mxu0 %vm30_vm0, %v758_v9 }
 0x13a   :  { %403 = vmatpush.msrb.mxu1 %v628_v46 }
 0x13c   :  { %404 = vmatpush.msrb.mxu1 %v627_v49 }
 0x13e   :  { %405 = vmatpush.msrb.mxu1 %v626_v50 }
 0x140   :  { %406 = vmatpush.msrb.mxu1 %v625_v51 }
 0x141   :  { %631 = vmatmul.msk.f32.vlgmr.msrb.gmra.mxu1 %vm30_vm0, %v753_v8  ;;  %630 = vmatmul.msk.f32.gmra.mxu0 %vm30_vm0, %v772_v11 }
 0x149   :  { %632 = vmatmul.msk.f32.gmra.mxu1 %vm30_vm0, %v767_v10 }
 0x182   :  { %v469_v56 = vpop.xlane.xlu0 %468 }
 0x183   :  { %v491_v57 = vsub.f32 %v113_v32, %v469_v56 }
 0x185   :  { %v499_v60 = vmul.f32 1.442695, %v491_v57 }
 0x187   :  { %640 = vpow2.f32 %v499_v60 }
 0x18a   :  { %v472_v15 = vpop.xlane.xlu0 %471 }
 0x18b   :  { %v492_v17 = vsub.f32 %v847_v34, %v472_v15 }
 0x18d   :  { %v641_v63 = vpop.eup %640  ;;  %v501_v18 = vmul.f32 1.442695, %v492_v17 }
 0x18e   :  { %v515_v2 = vsel %vm466_vm2, %v641_v63, 0.0 }
 0x19e   :  { %v221_v52 = vpop.f32.mrf.mxu0 }
 0x19f   :  { %v473_v53 = vsel %vm466_vm2, %v221_v52, -inf }
 0x1a0   :  { %474 = vmax.xlane.f32.xlu1 %v473_v53 }
 0x1a6   :  { %v247_v54 = vpop.f32.mrf.mxu1 }
 0x1a7   :  { %v476_v55 = vsel %vm466_vm2, %v247_v54, -inf }
 0x1a8   :  { %477 = vmax.xlane.f32.xlu1 %v476_v55 }
 0x1ae   :  { %v329_v58 = vpop.f32.mrf.mxu0 }
 0x1af   :  { %v479_v59 = vsel %vm466_vm2, %v329_v58, -inf }
 0x1b0   :  { %480 = vmax.xlane.f32.xlu2 %v479_v59 }
 0x1b6   :  { %v355_v61 = vpop.f32.mrf.mxu1  ;;  %v385_v0 = vpop.f32.mrf.mxu0 }
 0x1b7   :  { %v482_v62 = vsel %vm466_vm2, %v355_v61, -inf }
 0x1b8   :  { %483 = vmax.xlane.f32.xlu2 %v482_v62 }
 0x1be   :  { %v408_v1 = vpop.f32.mrf.mxu1  ;;  %v388_v4 = vpop.f32.mrf.mxu0 }
 0x1bf   :  { %633 = vmatpush.xpose.msk.msrb.mxu2 %vm89_vm1, %v408_v1 }
 0x1c0   :  { %516 = vadd.xlane.f32.xlu2 %v515_v2 }
 0x1c2   :  { %634 = vmatmul.msk.f32.vlgmr.msrb.gmra.mxu2 %vm89_vm1, %v385_v0 }
 0x1c6   :  { %v411_v3 = vpop.f32.mrf.mxu1 }
 0x1c7   :  { %635 = vmatpush.xpose.msk.msrb.mxu3 %vm89_vm1, %v411_v3 }
 0x1ca   :  { %636 = vmatmul.msk.f32.vlgmr.msrb.gmra.mxu3 %vm89_vm1, %v388_v4 }
 0x213   :  { %v475_v5 = vpop.xlane.xlu1 %474 }
 0x214   :  { %v493_v19 = vsub.f32 %v221_v52, %v475_v5 }
 0x216   :  { %v503_v23 = vmul.f32 1.442695, %v493_v19 }
 0x21b   :  { %v478_v6 = vpop.xlane.xlu1 %477 }
 0x21c   :  { %v494_v7 = vsub.f32 %v247_v54, %v478_v6 }
 0x21e   :  { %v505_v8 = vmul.f32 1.442695, %v494_v7 }
 0x220   :  { %642 = vpow2.f32 %v505_v8 }
 0x223   :  { %v481_v9 = vpop.xlane.xlu2 %480 }
 0x224   :  { %v495_v20 = vsub.f32 %v329_v58, %v481_v9 }
 0x226   :  { %v643_v10 = vpop.eup %642  ;;  %v507_v24 = vmul.f32 1.442695, %v495_v20 }
 0x227   :  { %v524_v11 = vsel %vm466_vm2, %v643_v10, 0.0 }
 0x228   :  { %525 = vadd.xlane.f32.xlu2 %v524_v11 }
 0x22b   :  { %v484_v12 = vpop.xlane.xlu2 %483 }
 0x22c   :  { %v496_v26 = vsub.f32 %v355_v61, %v484_v12 }
 0x22e   :  { %v509_v30 = vmul.f32 1.442695, %v496_v26 }
 0x233   :  { %v517_v13 = vpop.xlane.xlu2 %516 }
 0x234   :  { %644 = vrcp.f32 %v517_v13 }
 0x235   :  { %646 = vpow2.f32 %v501_v18 }
 0x236   :  { %648 = vpow2.f32 %v503_v23 }
 0x237   :  { %650 = vpow2.f32 %v507_v24 }
 0x238   :  { %652 = vpow2.f32 %v509_v30 }
 0x23a   :  { %v645_v14 = vpop.eup %644 }
 0x23b   :  { %v547_v16 = vmul.f32 %v645_v14, %v641_v63  ;;  %v647_v25 = vpop.eup %646 }
 0x23c   :  { %v518_v28 = vsel %vm466_vm2, %v647_v25, 0.0  ;;  %v649_v31 = vpop.eup %648 }
 0x23d   :  { %555 = vst.msk [vmem:[#allocation2] sm:$0xff] %vm466_vm2, %v547_v16  ;;  %v651_v32 = vpop.eup %650  ;;  %v521_v34 = vsel %vm466_vm2, %v649_v31, 0.0 }
 0x23e   :  { %v527_v33 = vsel %vm466_vm2, %v651_v32, 0.0  ;;  %v653_v35 = vpop.eup %652 }
 0x23f   :  { %v530_v36 = vsel %vm466_vm2, %v653_v35, 0.0 }
 0x245   :  { %v437_v21 = vpop.f32.mrf.mxu2 }
 0x246   :  { %v485_v22 = vsel %vm466_vm2, %v437_v21, -inf }
 0x247   :  { %486 = vmax.xlane.f32.xlu0 %v485_v22 }
 0x24d   :  { %v463_v27 = vpop.f32.mrf.mxu3 }
 0x24e   :  { %v488_v29 = vsel %vm466_vm2, %v463_v27, -inf }
 0x24f   :  { %519 = vadd.xlane.f32.xlu0 %v518_v28  ;;  %489 = vmax.xlane.f32.xlu1 %v488_v29 }
 0x257   :  { %528 = vadd.xlane.f32.xlu0 %v527_v33  ;;  %522 = vadd.xlane.f32.xlu1 %v521_v34 }
 0x25f   :  { %531 = vadd.xlane.f32.xlu1 %v530_v36 }
 0x29b   :  { %v526_v37 = vpop.xlane.xlu2 %525 }
 0x29c   :  { %654 = vrcp.f32 %v526_v37 }
 0x2a2   :  { %v655_v38 = vpop.eup %654 }
 0x2a3   :  { %v550_v39 = vmul.f32 %v655_v38, %v643_v10 }
 0x2a5   :  { %558 = vst.msk [vmem:[#allocation2 + $0x18] sm:$0xff] %vm466_vm2, %v550_v39 }
 0x2ba   :  { %v487_v40 = vpop.xlane.xlu0 %486 }
 0x2bb   :  { %v497_v41 = vsub.f32 %v437_v21, %v487_v40 }
 0x2bd   :  { %v511_v42 = vmul.f32 1.442695, %v497_v41 }
 0x2bf   :  { %656 = vpow2.f32 %v511_v42 }
 0x2c2   :  { %v520_v43 = vpop.xlane.xlu0 %519  ;;  %v490_v44 = vpop.xlane.xlu1 %489 }
 0x2c3   :  { %658 = vrcp.f32 %v520_v43  ;;  %v498_v45 = vsub.f32 %v463_v27, %v490_v44 }
 0x2c5   :  { %v657_v46 = vpop.eup %656  ;;  %v513_v47 = vmul.f32 1.442695, %v498_v45 }
 0x2c6   :  { %v533_v48 = vsel %vm466_vm2, %v657_v46, 0.0 }
 0x2c7   :  { %660 = vpow2.f32 %v513_v47  ;;  %534 = vadd.xlane.f32.xlu2 %v533_v48 }
 0x2c9   :  { %v659_v49 = vpop.eup %658 }
 0x2ca   :  { %v548_v50 = vmul.f32 %v659_v49, %v647_v25  ;;  %v529_v51 = vpop.xlane.xlu0 %528  ;;  %v523_v52 = vpop.xlane.xlu1 %522 }
 0x2cb   :  { %662 = vrcp.f32 %v529_v51 }
 0x2cc   :  { %556 = vst.msk [vmem:[#allocation2 + $0x8] sm:$0xff] %vm466_vm2, %v548_v50  ;;  %664 = vrcp.f32 %v523_v52 }
 0x2cd   :  { %v661_v53 = vpop.eup %660 }
 0x2ce   :  { %v536_v54 = vsel %vm466_vm2, %v661_v53, 0.0 }
 0x2cf   :  { %537 = vadd.xlane.f32.xlu0 %v536_v54 }
 0x2d1   :  { %v663_v55 = vpop.eup %662 }
 0x2d2   :  { %v665_v56 = vpop.eup %664  ;;  %v551_v57 = vmul.f32 %v663_v55, %v651_v32  ;;  %v532_v58 = vpop.xlane.xlu1 %531 }
 0x2d3   :  { %v549_v59 = vmul.f32 %v665_v56, %v649_v31  ;;  %666 = vrcp.f32 %v532_v58 }
 0x2d4   :  { %559 = vst.msk [vmem:[#allocation2 + $0x20] sm:$0xff] %vm466_vm2, %v551_v57 }
 0x2d5   :  { %557 = vst.msk [vmem:[#allocation2 + $0x10] sm:$0xff] %vm466_vm2, %v549_v59 }
 0x2d9   :  { %v667_v60 = vpop.eup %666 }
 0x2da   :  { %v552_v61 = vmul.f32 %v667_v60, %v653_v35 }
 0x2dc   :  { %560 = vst.msk [vmem:[#allocation2 + $0x28] sm:$0xff] %vm466_vm2, %v552_v61 }
 0x33a   :  { %v535_v62 = vpop.xlane.xlu2 %534 }
 0x33b   :  { %668 = vrcp.f32 %v535_v62 }
 0x341   :  { %v669_v63 = vpop.eup %668 }
 0x342   :  { %v553_v0 = vmul.f32 %v669_v63, %v657_v46  ;;  %v538_v1 = vpop.xlane.xlu0 %537 }
 0x343   :  { %670 = vrcp.f32 %v538_v1 }
 0x344   :  { %561 = vst.msk [vmem:[#allocation2 + $0x30] sm:$0xff] %vm466_vm2, %v553_v0 }
 0x349   :  { %v671_v2 = vpop.eup %670 }
 0x34a   :  { %v554_v3 = vmul.f32 %v671_v2, %v661_v53 }
 0x34c   :  { %562 = vst.msk [vmem:[#allocation2 + $0x38] sm:$0xff] %vm466_vm2, %v554_v3 }
 0x34d   :  { %575 = dma.vmem_to_hbm [thread:$0]  %s568_s30, 1024, %s570_s7, [#allocation3], %s699_s8, %s699_s8, %s700_s9  }
 0x34e   :  { %696 = dma.done.wait [#allocation3], 1024  }
 0x34f   :  { %697 = vsyncadd [#allocation3], 4294966272 }
 0x350   :  { %580 = vsyncpa [#allocation3], 1 }

</bundles_post_ra>
